<compile_context>
chip_gen: v6e
topology: v6e:2x2x1
jax: 0.10.0
libtpu: 0.0.40
codegen_flags: <defaults>
</compile_context>

<pallas_src>
import functools

import jax
import jax.numpy as jnp
from jax.experimental import pallas as pl
from jax.experimental.pallas import tpu as pltpu

_BIG = 1e30   # sentinel "no face covers this pixel" depth
_EPS = 1e-6   # degenerate-triangle |area| threshold (pixel^2 units)


# ----------------------------- Pallas kernel ------------------------------ #
def _rast_kernel(coef_ref, pix_ref, zbuf_ref, zmin_ref):
    """Rasterize one face-chunk of one image.

    coef_ref : (1, 4, FC, 8) per-face affine coefficients [A, B, bias, 0...]:
               rows 0..2 = sign(area)-corrected edge functions e0/e1/e2,
               row  3    = barycentric depth (already divided by area).
    pix_ref  : (8, H*W)      pixel basis, rows [px, py, 1, 0, 0, 0, 0, 0].
    zbuf_ref : (1, 1, H*W)   output depth buffer (lane-dense flat pixels).
    zmin_ref : (1, H*W)      VMEM accumulator for the running z-min.
    """
    fc = pl.program_id(1)

    @pl.when(fc == 0)
    def _init():
        zmin_ref[...] = jnp.full(zmin_ref.shape, _BIG, jnp.float32)

    pix = pix_ref[...]                                        # (8, HW)

    # All per-pixel x per-face affine evaluation on the (otherwise idle) MXU.
    e0 = jnp.dot(coef_ref[0, 0], pix, preferred_element_type=jnp.float32)
    e1 = jnp.dot(coef_ref[0, 1], pix, preferred_element_type=jnp.float32)
    e2 = jnp.dot(coef_ref[0, 2], pix, preferred_element_type=jnp.float32)
    z = jnp.dot(coef_ref[0, 3], pix, preferred_element_type=jnp.float32)

    # Inside test directly on sign-corrected edge functions (no w0/w1/w2);
    # z > 0 keeps only faces in front of the camera.
    inside = (e0 >= 0.0) & (e1 >= 0.0) & (e2 >= 0.0) & (z > 0.0)
    chunk_min = jnp.min(jnp.where(inside, z, _BIG), axis=0, keepdims=True)
    zmin_ref[...] = jnp.minimum(zmin_ref[...], chunk_min)     # (1, HW)

    @pl.when(fc == pl.num_programs(1) - 1)
    def _finalize():
        zm = zmin_ref[...]
        zbuf_ref[0] = jnp.where(zm < _BIG * 0.5, zm, -1.0)


# ------------------------------ JAX glue ----------------------------------- #
def _project(verts, cameras, H, W):
    """Project shared mesh vertices with per-camera [R|t] extrinsics."""
    R = cameras[:, :, :3]                                     # (N, 3, 3)
    t = cameras[:, :, 3]                                      # (N, 3)
    v_cam = jnp.einsum("nij,vj->nvi", R, verts) + t[:, None, :]
    z = v_cam[..., 2]
    # TODO(synk): no near-plane clipping; vertices with z <= 0 would produce
    # garbage screen coordinates (same limitation as the reference module).
    x_pix = (v_cam[..., 0] / z + 1.0) * 0.5 * W               # simple pinhole,
    y_pix = (v_cam[..., 1] / z + 1.0) * 0.5 * H               # NDC -> pixels
    return x_pix, y_pix, z


def _face_coeffs(fx, fy, fz):
    """Per-face affine coefficients for the kernel.

    fx, fy, fz: (N, F, 3). Returns (N, 4, F, 8): for each face, rows
    [e0*sgn, e1*sgn, e2*sgn, z/area] as [A, B, bias] so that
    plane(px, py) = A*px + B*py + bias. Degenerate / padded faces get an e0
    bias of -_BIG -> never inside.
    """
    x0, x1, x2 = fx[..., 0], fx[..., 1], fx[..., 2]
    y0, y1, y2 = fy[..., 0], fy[..., 1], fy[..., 2]
    z0, z1, z2 = fz[..., 0], fz[..., 1], fz[..., 2]

    A0, B0 = -(y2 - y1), (x2 - x1)
    A1, B1 = -(y0 - y2), (x0 - x2)
    A2, B2 = -(y1 - y0), (x1 - x0)
    D0 = (y2 - y1) * x1 - (x2 - x1) * y1
    D1 = (y0 - y2) * x2 - (x0 - x2) * y2
    D2 = (y1 - y0) * x0 - (x1 - x0) * y0

    area = (x1 - x0) * (y2 - y0) - (y1 - y0) * (x2 - x0)
    valid = jnp.abs(area) > _EPS
    sgn = jnp.where(valid, jnp.sign(area), 0.0)
    inv_area = jnp.where(valid, 1.0 / jnp.where(valid, area, 1.0), 0.0)

    Az = (A0 * z0 + A1 * z1 + A2 * z2) * inv_area
    Bz = (B0 * z0 + B1 * z1 + B2 * z2) * inv_area
    Dz = (D0 * z0 + D1 * z1 + D2 * z2) * inv_area

    e0 = jnp.stack([A0 * sgn, B0 * sgn,
                    jnp.where(valid, D0 * sgn, -_BIG)], axis=-1)
    e1 = jnp.stack([A1 * sgn, B1 * sgn, D1 * sgn], axis=-1)
    e2 = jnp.stack([A2 * sgn, B2 * sgn, D2 * sgn], axis=-1)
    zc = jnp.stack([Az, Bz, Dz], axis=-1)
    coef = jnp.stack([e0, e1, e2, zc], axis=1)                # (N, 4, F, 3)
    return jnp.pad(coef, ((0, 0), (0, 0), (0, 0), (0, 5))).astype(jnp.float32)


def _pixel_basis(H, W):
    """(8, H*W) pixel basis: rows [px, py, 1, 0, 0, 0, 0, 0] (pixel centers)."""
    ys, xs = jnp.meshgrid(jnp.arange(H, dtype=jnp.float32),
                          jnp.arange(W, dtype=jnp.float32), indexing="ij")
    px = xs.reshape(-1) + 0.5
    py = ys.reshape(-1) + 0.5
    rows = [px, py, jnp.ones_like(px)] + [jnp.zeros_like(px)] * 5
    return jnp.stack(rows, axis=0).astype(jnp.float32)


def rast_warper_forward(verts, faces, cameras, *, image_size=(16, 16),
                        face_chunk=128):
    """Pallas equivalent of RastWarper.forward -> zbuf of shape (N, H, W, 1)."""
    H, W = image_size
    HW = H * W
    N = cameras.shape[0]
    F = faces.shape[0]

    x_pix, y_pix, z = _project(verts, cameras, H, W)          # (N, V) each

    # Gather per-face vertex data: (N, F, 3).
    fx = x_pix[:, faces].astype(jnp.float32)
    fy = y_pix[:, faces].astype(jnp.float32)
    fz = z[:, faces].astype(jnp.float32)

    # Pad the face axis to whole chunks with zero (degenerate) faces;
    # _face_coeffs turns those into "never inside" coefficients.
    # Per-generation sizing: ~512 on v5e/v6e, ~256 on v7x (64 MiB VMEM);
    # 128 is plenty for this toy problem.
    face_chunk = max(8, (face_chunk // 8) * 8)
    Fp = max(face_chunk, -(-F // face_chunk) * face_chunk)
    pad = Fp - F
    fx = jnp.pad(fx, ((0, 0), (0, pad), (0, 0)))
    fy = jnp.pad(fy, ((0, 0), (0, pad), (0, 0)))
    fz = jnp.pad(fz, ((0, 0), (0, pad), (0, 0)))

    coef = _face_coeffs(fx, fy, fz)                           # (N, 4, Fp, 8)
    pbasis = _pixel_basis(H, W)                               # (8, HW)
    n_chunks = Fp // face_chunk

    zflat = pl.pallas_call(
        _rast_kernel,
        out_shape=jax.ShapeDtypeStruct((N, 1, HW), jnp.float32),
        grid_spec=pltpu.PrefetchScalarGridSpec(
            num_scalar_prefetch=0,
            grid=(N, n_chunks),                 # face-chunk reduction axis last
            in_specs=[
                pl.BlockSpec((1, 4, face_chunk, 8), lambda n, c: (n, 0, c, 0)),
                pl.BlockSpec((8, HW), lambda n, c: (0, 0)),
            ],
            out_specs=pl.BlockSpec((1, 1, HW), lambda n, c: (n, 0, 0)),
            scratch_shapes=[pltpu.VMEM((1, HW), jnp.float32)],
        ),
        compiler_params=pltpu.CompilerParams(
            dimension_semantics=("parallel", "arbitrary"),
            vmem_limit_bytes=32 * 1024 * 1024,
        ),
    )(coef, pbasis)

    return zflat.reshape(N, H, W, 1)                          # (N, H, W, 1)


# ------------------------- pure-JAX reference ----------------------------- #
def _reference_zbuf(verts, faces, cameras, image_size):
    """Original w0/w1/w2 formulation + per-pixel edge-decision margin."""
    H, W = image_size
    x_pix, y_pix, z = _project(verts, cameras, H, W)
    fx = x_pix[:, faces]                                      # (N, F, 3)
    fy = y_pix[:, faces]
    fz = z[:, faces]

    x0, x1, x2 = (fx[..., i][:, None, None, :] for i in range(3))
    y0, y1, y2 = (fy[..., i][:, None, None, :] for i in range(3))
    z0, z1, z2 = (fz[..., i][:, None, None, :] for i in range(3))

    py = (jnp.arange(H, dtype=jnp.float32) + 0.5)[None, :, None, None]
    px = (jnp.arange(W, dtype=jnp.float32) + 0.5)[None, None, :, None]

    e0 = (x2 - x1) * (py - y1) - (y2 - y1) * (px - x1)
    e1 = (x0 - x2) * (py - y2) - (y0 - y2) * (px - x2)
    e2 = (x1 - x0) * (py - y0) - (y1 - y0) * (px - x0)
    area = (x1 - x0) * (y2 - y0) - (y1 - y0) * (x2 - x0)
    valid = jnp.abs(area) > _EPS
    inv_area = jnp.where(valid, 1.0 / jnp.where(valid, area, 1.0), 0.0)
    w0, w1, w2 = e0 * inv_area, e1 * inv_area, e2 * inv_area
    inside = valid & (w0 >= 0) & (w1 >= 0) & (w2 >= 0)
    zz = w0 * z0 + w1 * z1 + w2 * z2
    inside = inside & (zz > 0.0)
    zmin = jnp.min(jnp.where(inside, zz, _BIG), axis=-1)
    zbuf = jnp.where(zmin < _BIG * 0.5, zmin, -1.0)[..., None]

    # Distance (in edge-function units) of each pixel center to the nearest
    # inside/outside decision boundary over all valid faces.
    sgn = jnp.sign(area)
    emin = jnp.minimum(jnp.minimum(e0 * sgn, e1 * sgn), e2 * sgn)
    margin = jnp.min(jnp.where(valid, jnp.abs(emin), _BIG), axis=-1)[..., None]
    return zbuf, margin


# --------------------------------- main ------------------------------------ #
if __name__ == "__main__":
    # RastWarper.__init__ only stores a rasterizer config; we fix its settings
    # deterministically: image_size=(16, 16), faces_per_pixel=1.
    # TODO(synk): faces_per_pixel > 1 (top-K nearest faces), blur_radius and
    # perspective-correct barycentrics are not implemented; K=1 hard z-min only.
    N, V, F, H, W = 2, 12, 10, 16, 16

    key = jax.random.PRNGKey(0)
    kv, kz, kf = jax.random.split(key, 3)
    xy = jax.random.uniform(kv, (V, 2), minval=-1.0, maxval=1.0)
    zz = jax.random.uniform(kz, (V, 1), minval=2.0, maxval=4.0)
    verts = jnp.concatenate([xy, zz], axis=-1).astype(jnp.float32)   # "meshes"
    faces = jax.random.randint(kf, (F, 3), 0, V).astype(jnp.int32)

    # "cameras": per-batch [R | t] extrinsics (identity and a small yaw).
    c, s = jnp.cos(0.1), jnp.sin(0.1)
    cam0 = jnp.concatenate([jnp.eye(3), jnp.zeros((3, 1))], axis=1)
    Ry = jnp.array([[c, 0.0, s], [0.0, 1.0, 0.0], [-s, 0.0, c]])
    cam1 = jnp.concatenate([Ry, jnp.array([[0.05], [0.0], [0.1]])], axis=1)
    cameras = jnp.stack([cam0, cam1]).astype(jnp.float32)            # (N, 3, 4)

    fwd = jax.jit(functools.partial(rast_warper_forward, image_size=(H, W)))
    zbuf = jax.block_until_ready(fwd(verts, faces, cameras))

    ref, margin = _reference_zbuf(verts, faces, cameras, (H, W))
    assert zbuf.shape == (N, H, W, 1), zbuf.shape
    assert zbuf.dtype == jnp.float32

    # Pixels whose center sits within `tau` (edge-function units) of an
    # inside/outside decision boundary are implementation-defined under f32
    # rounding (kernel evaluates the affine forms on the MXU, the reference on
    # the VPU); exclude that razor-thin band from the strict comparison.
    tau, atol = 0.1, 5e-3
    strict = margin > tau
    err = jnp.where(strict, jnp.abs(zbuf - ref), 0.0)
    assert bool(jnp.all(err <= atol)), float(jnp.max(err))
    assert float(strict.mean()) > 0.75          # sanity: excluded band is thin

    print("KERNEL_OK")
</pallas_src>

<mosaic_0001>
module attributes {stable_mosaic.version = 11 : i64} {
  func.func @_rast_kernel(%arg0: i32, %arg1: i32, %arg2: memref<1x4x128x8xf32, #tpu.memory_space<vmem>>, %arg3: memref<8x256xf32, #tpu.memory_space<vmem>>, %arg4: memref<1x1x256xf32, #tpu.memory_space<vmem>>, %arg5: memref<1x256xf32, #tpu.memory_space<vmem>>) attributes {dimension_semantics = [#tpu.dimension_semantics<parallel>, #tpu.dimension_semantics<arbitrary>], iteration_bounds = array<i64: 2, 1>, scalar_prefetch = 0 : i64, scratch_operands = 1 : i64, tpu.core_type = #tpu.core_type<tc>, window_params = [{transform_indices = @transform_0, window_bounds = array<i64: 1, 4, 128, 8>}, {pipeline_mode = #tpu.pipeline_mode<synchronous>, transform_indices = @transform_1, window_bounds = array<i64: 8, 256>}, {transform_indices = @transform_2, window_bounds = array<i64: 1, 1, 256>}]} {
    %c0_i32 = arith.constant 0 : i32
    %0 = arith.cmpi eq, %arg1, %c0_i32 : i32
    %1 = arith.extui %0 : i1 to i32
    %c0_i32_0 = arith.constant 0 : i32
    %2 = arith.cmpi ne, %1, %c0_i32_0 : i32
    scf.if %2 {
      %cst_30 = arith.constant 1.000000e+30 : f32
      %37 = vector.broadcast %cst_30 : f32 to vector<1x256xf32>
      %c0_31 = arith.constant 0 : index
      %c0_32 = arith.constant 0 : index
      %38 = vector.load %arg5[%c0_31, %c0_32] : memref<1x256xf32, #tpu.memory_space<vmem>>, vector<1x256xf32>
      tpu.vector_store %arg5[%c0_31, %c0_32], %37 {strides = array<i32>} : memref<1x256xf32, #tpu.memory_space<vmem>>, vector<1x256xf32>,
    } else {
    }
    %c0 = arith.constant 0 : index
    %c0_1 = arith.constant 0 : index
    %3 = vector.load %arg3[%c0, %c0_1] : memref<8x256xf32, #tpu.memory_space<vmem>>, vector<8x256xf32>
    %c0_2 = arith.constant 0 : index
    %c0_3 = arith.constant 0 : index
    %c0_4 = arith.constant 0 : index
    %c0_5 = arith.constant 0 : index
    %4 = vector.load %arg2[%c0_2, %c0_3, %c0_4, %c0_5] : memref<1x4x128x8xf32, #tpu.memory_space<vmem>>, vector<1x1x128x8xf32>
    %5 = vector.shape_cast %4 : vector<1x1x128x8xf32> to vector<128x8xf32>
    %cst = arith.constant dense<0.000000e+00> : vector<128x256xf32>
    %6 = tpu.matmul %5, %3, %cst {dimension_numbers = #tpu.dot_dimension_numbers<[1], [0], [0], [1], [0, 0, 1, 1], [], []>} : vector<128x8xf32>, vector<8x256xf32>, vector<128x256xf32> -> vector<128x256xf32>
    %c0_6 = arith.constant 0 : index
    %c1 = arith.constant 1 : index
    %c0_7 = arith.constant 0 : index
    %c0_8 = arith.constant 0 : index
    %7 = vector.load %arg2[%c0_6, %c1, %c0_7, %c0_8] : memref<1x4x128x8xf32, #tpu.memory_space<vmem>>, vector<1x1x128x8xf32>
    %8 = vector.shape_cast %7 : vector<1x1x128x8xf32> to vector<128x8xf32>
    %cst_9 = arith.constant dense<0.000000e+00> : vector<128x256xf32>
    %9 = tpu.matmul %8, %3, %cst_9 {dimension_numbers = #tpu.dot_dimension_numbers<[1], [0], [0], [1], [0, 0, 1, 1], [], []>} : vector<128x8xf32>, vector<8x256xf32>, vector<128x256xf32> -> vector<128x256xf32>
    %c0_10 = arith.constant 0 : index
    %c2 = arith.constant 2 : index
    %c0_11 = arith.constant 0 : index
    %c0_12 = arith.constant 0 : index
    %10 = vector.load %arg2[%c0_10, %c2, %c0_11, %c0_12] : memref<1x4x128x8xf32, #tpu.memory_space<vmem>>, vector<1x1x128x8xf32>
    %11 = vector.shape_cast %10 : vector<1x1x128x8xf32> to vector<128x8xf32>
    %cst_13 = arith.constant dense<0.000000e+00> : vector<128x256xf32>
    %12 = tpu.matmul %11, %3, %cst_13 {dimension_numbers = #tpu.dot_dimension_numbers<[1], [0], [0], [1], [0, 0, 1, 1], [], []>} : vector<128x8xf32>, vector<8x256xf32>, vector<128x256xf32> -> vector<128x256xf32>
    %c0_14 = arith.constant 0 : index
    %c3 = arith.constant 3 : index
    %c0_15 = arith.constant 0 : index
    %c0_16 = arith.constant 0 : index
    %13 = vector.load %arg2[%c0_14, %c3, %c0_15, %c0_16] : memref<1x4x128x8xf32, #tpu.memory_space<vmem>>, vector<1x1x128x8xf32>
    %14 = vector.shape_cast %13 : vector<1x1x128x8xf32> to vector<128x8xf32>
    %cst_17 = arith.constant dense<0.000000e+00> : vector<128x256xf32>
    %15 = tpu.matmul %14, %3, %cst_17 {dimension_numbers = #tpu.dot_dimension_numbers<[1], [0], [0], [1], [0, 0, 1, 1], [], []>} : vector<128x8xf32>, vector<8x256xf32>, vector<128x256xf32> -> vector<128x256xf32>
    %cst_18 = arith.constant 0.000000e+00 : f32
    %16 = vector.broadcast %cst_18 : f32 to vector<128x256xf32>
    %17 = arith.cmpf oge, %6, %16 : vector<128x256xf32>
    %cst_19 = arith.constant 0.000000e+00 : f32
    %18 = vector.broadcast %cst_19 : f32 to vector<128x256xf32>
    %19 = arith.cmpf oge, %9, %18 : vector<128x256xf32>
    %20 = arith.andi %17, %19 : vector<128x256xi1>
    %cst_20 = arith.constant 0.000000e+00 : f32
    %21 = vector.broadcast %cst_20 : f32 to vector<128x256xf32>
    %22 = arith.cmpf oge, %12, %21 : vector<128x256xf32>
    %23 = arith.andi %20, %22 : vector<128x256xi1>
    %cst_21 = arith.constant 0.000000e+00 : f32
    %24 = vector.broadcast %cst_21 : f32 to vector<128x256xf32>
    %25 = arith.cmpf ogt, %15, %24 : vector<128x256xf32>
    %26 = arith.andi %23, %25 : vector<128x256xi1>
    %cst_22 = arith.constant 1.000000e+30 : f32
    %27 = vector.broadcast %cst_22 : f32 to vector<128x256xf32>
    %28 = arith.select %26, %15, %27 : vector<128x256xi1>, vector<128x256xf32>
    %cst_23 = arith.constant dense<0x7F800000> : vector<256xf32>
    %29 = vector.multi_reduction <minimumf>, %28, %cst_23 [0] : vector<128x256xf32> to vector<256xf32>
    %30 = vector.shape_cast %29 : vector<256xf32> to vector<1x256xf32>
    %c0_24 = arith.constant 0 : index
    %c0_25 = arith.constant 0 : index
    %31 = vector.load %arg5[%c0_24, %c0_25] : memref<1x256xf32, #tpu.memory_space<vmem>>, vector<1x256xf32>
    %32 = arith.minimumf %31, %30 : vector<1x256xf32>
    %c0_26 = arith.constant 0 : index
    %c0_27 = arith.constant 0 : index
    %33 = vector.load %arg5[%c0_26, %c0_27] : memref<1x256xf32, #tpu.memory_space<vmem>>, vector<1x256xf32>
    tpu.vector_store %arg5[%c0_26, %c0_27], %32 {strides = array<i32>} : memref<1x256xf32, #tpu.memory_space<vmem>>, vector<1x256xf32>,
    %c0_i32_28 = arith.constant 0 : i32
    %34 = arith.cmpi eq, %arg1, %c0_i32_28 : i32
    %35 = arith.extui %34 : i1 to i32
    %c0_i32_29 = arith.constant 0 : i32
    %36 = arith.cmpi ne, %35, %c0_i32_29 : i32
    scf.if %36 {
      %c0_30 = arith.constant 0 : index
      %c0_31 = arith.constant 0 : index
      %37 = vector.load %arg5[%c0_30, %c0_31] : memref<1x256xf32, #tpu.memory_space<vmem>>, vector<1x256xf32>
      %cst_32 = arith.constant 5.000000e+29 : f32
      %38 = vector.broadcast %cst_32 : f32 to vector<1x256xf32>
      %39 = arith.cmpf olt, %37, %38 : vector<1x256xf32>
      %cst_33 = arith.constant -1.000000e+00 : f32
      %40 = vector.broadcast %cst_33 : f32 to vector<1x256xf32>
      %41 = arith.select %39, %37, %40 : vector<1x256xi1>, vector<1x256xf32>
      %c0_34 = arith.constant 0 : index
      %c0_35 = arith.constant 0 : index
      %c0_36 = arith.constant 0 : index
      %42 = vector.load %arg4[%c0_34, %c0_35, %c0_36] : memref<1x1x256xf32, #tpu.memory_space<vmem>>, vector<1x1x256xf32>
      %43 = vector.shape_cast %42 : vector<1x1x256xf32> to vector<1x256xf32>
      %44 = vector.shape_cast %41 : vector<1x256xf32> to vector<1x1x256xf32>
      tpu.vector_store %arg4[%c0_34, %c0_35, %c0_36], %44 {strides = array<i32>} : memref<1x1x256xf32, #tpu.memory_space<vmem>>, vector<1x1x256xf32>,
    } else {
    }
    return
  }
  func.func @transform_0(%arg0: i32, %arg1: i32) -> (i32, i32, i32, i32) {
    %c0_i32 = arith.constant 0 : i32
    %c0_i32_0 = arith.constant 0 : i32
    %c0_i32_1 = arith.constant 0 : i32
    return %arg0, %c0_i32, %arg1, %c0_i32_0 : i32, i32, i32, i32
  }
  func.func @transform_1(%arg0: i32, %arg1: i32) -> (i32, i32) {
    %c0_i32 = arith.constant 0 : i32
    %c0_i32_0 = arith.constant 0 : i32
    %c0_i32_1 = arith.constant 0 : i32
    return %c0_i32, %c0_i32_0 : i32, i32
  }
  func.func @transform_2(%arg0: i32, %arg1: i32) -> (i32, i32, i32) {
    %c0_i32 = arith.constant 0 : i32
    %c0_i32_0 = arith.constant 0 : i32
    %c0_i32_1 = arith.constant 0 : i32
    return %arg0, %c0_i32, %c0_i32_0 : i32, i32, i32
  }
}

</mosaic_0001>

<bundles_post_ra>
// kernel: rast_warper_forward.1
= control target key start
LH: loop header
LB: loop body
LE: loop exit
PB: predicated region body
PF: predicated region fallthrough
CT: control target
= control target key end

     0   :  { %s1674_s9 = smov 0   ;;  %s1676_s10 = smov 0   ;;  %s2145_s0 = inlined_call_operand.vmem [shape: f32[2,4,128,8], index: 0, kind: input, shape index: {}]   ;;  %s2146_s1 = inlined_call_operand.vmem [shape: f32[8,256], index: 1, kind: input, shape index: {}]   ;;  %s2147_s2 = inlined_call_operand.vmem [shape: f32[2,1,256], index: 2, kind: output, shape index: {}]  }
   0x1   :  { %s1678_s11 = smov 0  }
   0x2 LB: > { %s24_s12 = sadd.s32 1, %s1650_s10  ;;  %p1486_p0 = scmp.ge.s32.totalorder %s1654_s11, 1  ;;  %s1654_s11 = sphi %s1678_s11, %s12_s11   ;;  %s1650_s10 = sphi %s1676_s10, %s2251_s10   ;;  %s1646_s9 = sphi %s1674_s9, %s2250_s9  }
   0x3   : > { %p26_p1 = scmp.ge.s32.totalorder %s24_s12, 2  ;;  %p131_p2 = scmp.lt.s32.totalorder %s1654_s11, 3 }
   0x5   : > { %s2253_s12 = smov (%p26_p1, %s24_s12), 0  ;;  %p132_p3 = pnand %p1486_p0, %p131_p2 }
   0x6   : > { %p157_p4 = scmp.lt.s32.totalorder (!%p132_p3), %s1646_s9, 1 }
   0x7   : > { %135 = sbr.rel (%p132_p3) target bundleno = 376 (0x178), region = 28 }
   0xc   : > { %v180_v0 = vld [vmem:[%s2146_s1 + $0x8] sm:$0xff]  ;;  %v179_v1 = vld [vmem:[%s2146_s1] sm:$0xff]  ;;  %v1656_v2 = vmov 0.0   ;;  %s2255_s9 = smov (!%p157_p4, %s1646_s9), 1  ;;  %vm197_vm0 = vcmask 64512  }
   0xd   : > { %276 = vmatprep.subr.mxu0 %v180_v0  ;;  %502 = vmatprep.subr.mxu1 %v180_v0  ;;  %s1604_s17 = sshll.u32 %s2255_s9, 9  ;;  %s1489_s21 = sshll.u32 %s2255_s9, 1 }
   0xe   : > { %277 = vmatpush1.msra.mxu0 %v179_v1  ;;  %310 = vmatprep.mubr.f32.mxu0 %v1656_v2  ;;  %s1706_s20 = scalar_lea.vmem %s2145_s0, %s1604_s17  ;;  %s169_s24 = scalar_lea.vmem %s2147_s2, %s1489_s21 }
   0xf   : > { %503 = vmatpush1.msra.mxu1 %v179_v1  ;;  %536 = vmatprep.mubr.f32.mxu1 %v1656_v2  ;;  %v181_v3 = vld [vmem:[%s1706_s20] sm:$0xff]  ;;  %v182_v5 = vld [vmem:[%s1706_s20 + $0x8] sm:$0xff]  ;;  %v183_v7 = vld [vmem:[%s1706_s20 + $0x10] sm:$0xff] }
  0x10   : > { %728 = vmatprep.subr.mxu0 %v180_v0  ;;  %954 = vmatprep.subr.mxu1 %v180_v0  ;;  %v1506_v4 = vld [vmem:[%s1706_s20 + $0x80] sm:$0xff]  ;;  %v1507_v6 = vld [vmem:[%s1706_s20 + $0x88] sm:$0xff]  ;;  %v1508_v8 = vld [vmem:[%s1706_s20 + $0x90] sm:$0xff] }
  0x11   : > { %1490 = vmatmul.mubr.msk.f32.vlgmr.msra.gmra.mxu0 %vm197_vm0, %v181_v3  ;;  %1522 = vmatmul.mubr.msk.f32.vlgmr.msra.gmra.mxu1 %vm197_vm0, %v1506_v4  ;;  %v184_v9 = vld [vmem:[%s1706_s20 + $0x18] sm:$0xff]  ;;  %v185_v11 = vld [vmem:[%s1706_s20 + $0x20] sm:$0xff]  ;;  %v186_v13 = vld [vmem:[%s1706_s20 + $0x28] sm:$0xff] }
  0x12   : > { %729 = vmatpush1.msra.mxu0 %v179_v1  ;;  %955 = vmatpush1.msra.mxu1 %v179_v1  ;;  %v1509_v10 = vld [vmem:[%s1706_s20 + $0x98] sm:$0xff]  ;;  %v1510_v12 = vld [vmem:[%s1706_s20 + $0xa0] sm:$0xff]  ;;  %v1511_v14 = vld [vmem:[%s1706_s20 + $0xa8] sm:$0xff] }
  0x13   : > { %316 = vmatprep.mubr.f32.mxu0 %v1656_v2  ;;  %542 = vmatprep.mubr.f32.mxu1 %v1656_v2  ;;  %v187_v15 = vld [vmem:[%s1706_s20 + $0x30] sm:$0xff]  ;;  %v188_v17 = vld [vmem:[%s1706_s20 + $0x38] sm:$0xff]  ;;  %v189_v19 = vld [vmem:[%s1706_s20 + $0x40] sm:$0xff] }
  0x14   : > { %v1512_v16 = vld [vmem:[%s1706_s20 + $0xb0] sm:$0xff]  ;;  %v1513_v18 = vld [vmem:[%s1706_s20 + $0xb8] sm:$0xff]  ;;  %v1514_v20 = vld [vmem:[%s1706_s20 + $0xc0] sm:$0xff] }
  0x15   : > { %1491 = vmatmul.mubr.msk.f32.gmra.mxu0 %vm197_vm0, %v182_v5  ;;  %1523 = vmatmul.mubr.msk.f32.gmra.mxu1 %vm197_vm0, %v1507_v6  ;;  %v190_v21 = vld [vmem:[%s1706_s20 + $0x48] sm:$0xff]  ;;  %v191_v23 = vld [vmem:[%s1706_s20 + $0x50] sm:$0xff]  ;;  %v192_v25 = vld [vmem:[%s1706_s20 + $0x58] sm:$0xff] }
  0x16   : > { %322 = vmatprep.mubr.f32.mxu0 %v1656_v2  ;;  %548 = vmatprep.mubr.f32.mxu1 %v1656_v2  ;;  %v1515_v22 = vld [vmem:[%s1706_s20 + $0xc8] sm:$0xff]  ;;  %v1516_v24 = vld [vmem:[%s1706_s20 + $0xd0] sm:$0xff]  ;;  %v1517_v26 = vld [vmem:[%s1706_s20 + $0xd8] sm:$0xff] }
  0x17   : > { %v193_v27 = vld [vmem:[%s1706_s20 + $0x60] sm:$0xff]  ;;  %v194_v29 = vld [vmem:[%s1706_s20 + $0x68] sm:$0xff]  ;;  %v195_v31 = vld [vmem:[%s1706_s20 + $0x70] sm:$0xff] }
  0x18   : > { %v1518_v28 = vld [vmem:[%s1706_s20 + $0xe0] sm:$0xff]  ;;  %v1519_v30 = vld [vmem:[%s1706_s20 + $0xe8] sm:$0xff]  ;;  %v1520_v32 = vld [vmem:[%s1706_s20 + $0xf0] sm:$0xff] }
  0x19   : > { %1492 = vmatmul.mubr.msk.f32.gmra.mxu0 %vm197_vm0, %v183_v7  ;;  %1524 = vmatmul.mubr.msk.f32.gmra.mxu1 %vm197_vm0, %v1508_v8  ;;  %v196_v33 = vld [vmem:[%s1706_s20 + $0x78] sm:$0xff]  ;;  %v1538_v35 = vld [vmem:[%s1706_s20 + $0x100] sm:$0xff]  ;;  %v1539_v37 = vld [vmem:[%s1706_s20 + $0x108] sm:$0xff] }
  0x1a   : > { %328 = vmatprep.mubr.f32.mxu0 %v1656_v2  ;;  %554 = vmatprep.mubr.f32.mxu1 %v1656_v2  ;;  %v1521_v34 = vld [vmem:[%s1706_s20 + $0xf8] sm:$0xff]  ;;  %v1570_v36 = vld [vmem:[%s1706_s20 + $0x180] sm:$0xff]  ;;  %v1571_v38 = vld [vmem:[%s1706_s20 + $0x188] sm:$0xff] }
  0x1b   : > { %v1540_v39 = vld [vmem:[%s1706_s20 + $0x110] sm:$0xff]  ;;  %v1541_v41 = vld [vmem:[%s1706_s20 + $0x118] sm:$0xff]  ;;  %v1542_v43 = vld [vmem:[%s1706_s20 + $0x120] sm:$0xff] }
  0x1c   : > { %v1572_v40 = vld [vmem:[%s1706_s20 + $0x190] sm:$0xff]  ;;  %v1573_v42 = vld [vmem:[%s1706_s20 + $0x198] sm:$0xff]  ;;  %v1574_v44 = vld [vmem:[%s1706_s20 + $0x1a0] sm:$0xff] }
  0x1d   : > { %1493 = vmatmul.mubr.msk.f32.gmra.mxu0 %vm197_vm0, %v184_v9  ;;  %1525 = vmatmul.mubr.msk.f32.gmra.mxu1 %vm197_vm0, %v1509_v10  ;;  %v1543_v45 = vld [vmem:[%s1706_s20 + $0x128] sm:$0xff]  ;;  %v1544_v47 = vld [vmem:[%s1706_s20 + $0x130] sm:$0xff]  ;;  %v1545_v49 = vld [vmem:[%s1706_s20 + $0x138] sm:$0xff] }
  0x1e   : > { %334 = vmatprep.mubr.f32.mxu0 %v1656_v2  ;;  %560 = vmatprep.mubr.f32.mxu1 %v1656_v2  ;;  %v1575_v46 = vld [vmem:[%s1706_s20 + $0x1a8] sm:$0xff]  ;;  %v1576_v48 = vld [vmem:[%s1706_s20 + $0x1b0] sm:$0xff]  ;;  %v1577_v50 = vld [vmem:[%s1706_s20 + $0x1b8] sm:$0xff] }
  0x1f   : > { %v1546_v51 = vld [vmem:[%s1706_s20 + $0x140] sm:$0xff]  ;;  %v1547_v53 = vld [vmem:[%s1706_s20 + $0x148] sm:$0xff]  ;;  %v1548_v55 = vld [vmem:[%s1706_s20 + $0x150] sm:$0xff] }
  0x20   : > { %v1578_v52 = vld [vmem:[%s1706_s20 + $0x1c0] sm:$0xff]  ;;  %v1579_v54 = vld [vmem:[%s1706_s20 + $0x1c8] sm:$0xff]  ;;  %v1580_v56 = vld [vmem:[%s1706_s20 + $0x1d0] sm:$0xff] }
  0x21   : > { %1494 = vmatmul.mubr.msk.f32.gmra.mxu0 %vm197_vm0, %v185_v11  ;;  %1526 = vmatmul.mubr.msk.f32.gmra.mxu1 %vm197_vm0, %v1510_v12  ;;  %v1549_v57 = vld [vmem:[%s1706_s20 + $0x158] sm:$0xff]  ;;  %v1550_v59 = vld [vmem:[%s1706_s20 + $0x160] sm:$0xff]  ;;  %v1551_v61 = vld [vmem:[%s1706_s20 + $0x168] sm:$0xff] }
  0x22   : > { %340 = vmatprep.mubr.f32.mxu0 %v1656_v2  ;;  %566 = vmatprep.mubr.f32.mxu1 %v1656_v2  ;;  %v1581_v58 = vld [vmem:[%s1706_s20 + $0x1d8] sm:$0xff]  ;;  %v1582_v60 = vld [vmem:[%s1706_s20 + $0x1e0] sm:$0xff]  ;;  %v1583_v62 = vld [vmem:[%s1706_s20 + $0x1e8] sm:$0xff] }
  0x23   : > { %v1552_v63 = vld [vmem:[%s1706_s20 + $0x170] sm:$0xff]  ;;  %v1553_v1 = vld [vmem:[%s1706_s20 + $0x178] sm:$0xff] }
  0x24   : > { %v1584_v0 = vld [vmem:[%s1706_s20 + $0x1f0] sm:$0xff]  ;;  %v1585_v3 = vld [vmem:[%s1706_s20 + $0x1f8] sm:$0xff] }
  0x25   : > { %1495 = vmatmul.mubr.msk.f32.gmra.mxu0 %vm197_vm0, %v186_v13  ;;  %1527 = vmatmul.mubr.msk.f32.gmra.mxu1 %vm197_vm0, %v1511_v14 }
  0x26   : > { %346 = vmatprep.mubr.f32.mxu0 %v1656_v2  ;;  %572 = vmatprep.mubr.f32.mxu1 %v1656_v2 }
  0x29   : > { %1496 = vmatmul.mubr.msk.f32.gmra.mxu0 %vm197_vm0, %v187_v15  ;;  %1528 = vmatmul.mubr.msk.f32.gmra.mxu1 %vm197_vm0, %v1512_v16 }
  0x2a   : > { %352 = vmatprep.mubr.f32.mxu0 %v1656_v2  ;;  %578 = vmatprep.mubr.f32.mxu1 %v1656_v2 }
  0x2d   : > { %1497 = vmatmul.mubr.msk.f32.gmra.mxu0 %vm197_vm0, %v188_v17  ;;  %1529 = vmatmul.mubr.msk.f32.gmra.mxu1 %vm197_vm0, %v1513_v18 }
  0x2e   : > { %358 = vmatprep.mubr.f32.mxu0 %v1656_v2  ;;  %584 = vmatprep.mubr.f32.mxu1 %v1656_v2 }
  0x31   : > { %1498 = vmatmul.mubr.msk.f32.gmra.mxu0 %vm197_vm0, %v189_v19  ;;  %1530 = vmatmul.mubr.msk.f32.gmra.mxu1 %vm197_vm0, %v1514_v20 }
  0x32   : > { %364 = vmatprep.mubr.f32.mxu0 %v1656_v2  ;;  %590 = vmatprep.mubr.f32.mxu1 %v1656_v2 }
  0x35   : > { %1499 = vmatmul.mubr.msk.f32.gmra.mxu0 %vm197_vm0, %v190_v21  ;;  %1531 = vmatmul.mubr.msk.f32.gmra.mxu1 %vm197_vm0, %v1515_v22 }
  0x36   : > { %370 = vmatprep.mubr.f32.mxu0 %v1656_v2  ;;  %596 = vmatprep.mubr.f32.mxu1 %v1656_v2 }
  0x39   : > { %1500 = vmatmul.mubr.msk.f32.gmra.mxu0 %vm197_vm0, %v191_v23  ;;  %1532 = vmatmul.mubr.msk.f32.gmra.mxu1 %vm197_vm0, %v1516_v24  ;;  %v2162_v23 = vmov 0 }
  0x3a   : > { %376 = vmatprep.mubr.f32.mxu0 %v1656_v2  ;;  %602 = vmatprep.mubr.f32.mxu1 %v1656_v2 }
  0x3d   : > { %1501 = vmatmul.mubr.msk.f32.gmra.mxu0 %vm197_vm0, %v192_v25  ;;  %1533 = vmatmul.mubr.msk.f32.gmra.mxu1 %vm197_vm0, %v1517_v26  ;;  %v174_v26 = vlaneseq }
  0x3e   : > { %382 = vmatprep.mubr.f32.mxu0 %v1656_v2  ;;  %608 = vmatprep.mubr.f32.mxu1 %v1656_v2 }
  0x41   : > { %1502 = vmatmul.mubr.msk.f32.gmra.mxu0 %vm197_vm0, %v193_v27  ;;  %1534 = vmatmul.mubr.msk.f32.gmra.mxu1 %vm197_vm0, %v1518_v28  ;;  %v2164_v27 = vmov 0 }
  0x42   : > { %388 = vmatprep.mubr.f32.mxu0 %v1656_v2  ;;  %614 = vmatprep.mubr.f32.mxu1 %v1656_v2 }
  0x45   : > { %1503 = vmatmul.mubr.msk.f32.gmra.mxu0 %vm197_vm0, %v194_v29  ;;  %1535 = vmatmul.mubr.msk.f32.gmra.mxu1 %vm197_vm0, %v1519_v30  ;;  %v2166_v30 = vmov 0 }
  0x46   : > { %394 = vmatprep.mubr.f32.mxu0 %v1656_v2  ;;  %620 = vmatprep.mubr.f32.mxu1 %v1656_v2 }
  0x49   : > { %1504 = vmatmul.mubr.msk.f32.gmra.mxu0 %vm197_vm0, %v195_v31  ;;  %1536 = vmatmul.mubr.msk.f32.gmra.mxu1 %vm197_vm0, %v1520_v32  ;;  %v1657_v31 = vmov 1e+30   ;;  %v2168_v32 = vmov 0 }
  0x4a   : > { %400 = vmatprep.mubr.f32.mxu0 %v1656_v2  ;;  %626 = vmatprep.mubr.f32.mxu1 %v1656_v2 }
  0x4d   : > { %1505 = vmatmul.mubr.msk.f32.gmra.mxu0 %vm197_vm0, %v196_v33  ;;  %1537 = vmatmul.mubr.msk.f32.gmra.mxu1 %vm197_vm0, %v1521_v34 }
  0x4e   : > { %762 = vmatprep.mubr.f32.mxu0 %v1656_v2  ;;  %988 = vmatprep.mubr.f32.mxu1 %v1656_v2 }
  0x51   : > { %1554 = vmatmul.mubr.msk.f32.vlgmr.msra.gmra.mxu0 %vm197_vm0, %v1538_v35  ;;  %1586 = vmatmul.mubr.msk.f32.vlgmr.msra.gmra.mxu1 %vm197_vm0, %v1570_v36  ;;  %v2170_v35 = vmov 0 }
  0x52   : > { %768 = vmatprep.mubr.f32.mxu0 %v1656_v2  ;;  %994 = vmatprep.mubr.f32.mxu1 %v1656_v2 }
  0x55   : > { %1555 = vmatmul.mubr.msk.f32.gmra.mxu0 %vm197_vm0, %v1539_v37  ;;  %1587 = vmatmul.mubr.msk.f32.gmra.mxu1 %vm197_vm0, %v1571_v38  ;;  %v2172_v38 = vmov 0 }
  0x56   : > { %774 = vmatprep.mubr.f32.mxu0 %v1656_v2  ;;  %1000 = vmatprep.mubr.f32.mxu1 %v1656_v2 }
  0x59   : > { %1556 = vmatmul.mubr.msk.f32.gmra.mxu0 %vm197_vm0, %v1540_v39  ;;  %1588 = vmatmul.mubr.msk.f32.gmra.mxu1 %vm197_vm0, %v1572_v40 }
  0x5a   : > { %780 = vmatprep.mubr.f32.mxu0 %v1656_v2  ;;  %1006 = vmatprep.mubr.f32.mxu1 %v1656_v2 }
  0x5d   : > { %1557 = vmatmul.mubr.msk.f32.gmra.mxu0 %vm197_vm0, %v1541_v41  ;;  %1589 = vmatmul.mubr.msk.f32.gmra.mxu1 %vm197_vm0, %v1573_v42  ;;  %v2174_v41 = vmov 0 }
  0x5e   : > { %786 = vmatprep.mubr.f32.mxu0 %v1656_v2  ;;  %1012 = vmatprep.mubr.f32.mxu1 %v1656_v2 }
  0x61   : > { %1558 = vmatmul.mubr.msk.f32.gmra.mxu0 %vm197_vm0, %v1542_v43  ;;  %1590 = vmatmul.mubr.msk.f32.gmra.mxu1 %vm197_vm0, %v1574_v44  ;;  %v2176_v44 = vmov 0 }
  0x62   : > { %792 = vmatprep.mubr.f32.mxu0 %v1656_v2  ;;  %1018 = vmatprep.mubr.f32.mxu1 %v1656_v2 }
  0x65   : > { %1559 = vmatmul.mubr.msk.f32.gmra.mxu0 %vm197_vm0, %v1543_v45  ;;  %1591 = vmatmul.mubr.msk.f32.gmra.mxu1 %vm197_vm0, %v1575_v46 }
  0x66   : > { %798 = vmatprep.mubr.f32.mxu0 %v1656_v2  ;;  %1024 = vmatprep.mubr.f32.mxu1 %v1656_v2 }
  0x69   : > { %1560 = vmatmul.mubr.msk.f32.gmra.mxu0 %vm197_vm0, %v1544_v47  ;;  %1592 = vmatmul.mubr.msk.f32.gmra.mxu1 %vm197_vm0, %v1576_v48  ;;  %v2178_v47 = vmov 0 }
  0x6a   : > { %804 = vmatprep.mubr.f32.mxu0 %v1656_v2  ;;  %1030 = vmatprep.mubr.f32.mxu1 %v1656_v2 }
  0x6d   : > { %1561 = vmatmul.mubr.msk.f32.gmra.mxu0 %vm197_vm0, %v1545_v49  ;;  %1593 = vmatmul.mubr.msk.f32.gmra.mxu1 %vm197_vm0, %v1577_v50  ;;  %v2180_v50 = vmov 0 }
  0x6e   : > { %810 = vmatprep.mubr.f32.mxu0 %v1656_v2  ;;  %1036 = vmatprep.mubr.f32.mxu1 %v1656_v2 }
  0x71   : > { %1562 = vmatmul.mubr.msk.f32.gmra.mxu0 %vm197_vm0, %v1546_v51  ;;  %1594 = vmatmul.mubr.msk.f32.gmra.mxu1 %vm197_vm0, %v1578_v52 }
  0x72   : > { %816 = vmatprep.mubr.f32.mxu0 %v1656_v2  ;;  %1042 = vmatprep.mubr.f32.mxu1 %v1656_v2 }
  0x75   : > { %1563 = vmatmul.mubr.msk.f32.gmra.mxu0 %vm197_vm0, %v1547_v53  ;;  %1595 = vmatmul.mubr.msk.f32.gmra.mxu1 %vm197_vm0, %v1579_v54  ;;  %v2182_v53 = vmov 0 }
  0x76   : > { %822 = vmatprep.mubr.f32.mxu0 %v1656_v2  ;;  %1048 = vmatprep.mubr.f32.mxu1 %v1656_v2 }
  0x79   : > { %1564 = vmatmul.mubr.msk.f32.gmra.mxu0 %vm197_vm0, %v1548_v55  ;;  %1596 = vmatmul.mubr.msk.f32.gmra.mxu1 %vm197_vm0, %v1580_v56  ;;  %v2184_v56 = vmov 0 }
  0x7a   : > { %828 = vmatprep.mubr.f32.mxu0 %v1656_v2  ;;  %1054 = vmatprep.mubr.f32.mxu1 %v1656_v2 }
  0x7d   : > { %1565 = vmatmul.mubr.msk.f32.gmra.mxu0 %vm197_vm0, %v1549_v57  ;;  %1597 = vmatmul.mubr.msk.f32.gmra.mxu1 %vm197_vm0, %v1581_v58 }
  0x7e   : > { %834 = vmatprep.mubr.f32.mxu0 %v1656_v2  ;;  %1060 = vmatprep.mubr.f32.mxu1 %v1656_v2 }
  0x81   : > { %1566 = vmatmul.mubr.msk.f32.gmra.mxu0 %vm197_vm0, %v1550_v59  ;;  %1598 = vmatmul.mubr.msk.f32.gmra.mxu1 %vm197_vm0, %v1582_v60  ;;  %v2186_v59 = vmov 0 }
  0x82   : > { %840 = vmatprep.mubr.f32.mxu0 %v1656_v2  ;;  %1066 = vmatprep.mubr.f32.mxu1 %v1656_v2 }
  0x85   : > { %1567 = vmatmul.mubr.msk.f32.gmra.mxu0 %vm197_vm0, %v1551_v61  ;;  %1599 = vmatmul.mubr.msk.f32.gmra.mxu1 %vm197_vm0, %v1583_v62  ;;  %v2188_v62 = vmov 0 }
  0x86   : > { %846 = vmatprep.mubr.f32.mxu0 %v1656_v2  ;;  %1072 = vmatprep.mubr.f32.mxu1 %v1656_v2 }
  0x89   : > { %1568 = vmatmul.mubr.msk.f32.gmra.mxu0 %vm197_vm0, %v1552_v63  ;;  %1600 = vmatmul.mubr.msk.f32.gmra.mxu1 %vm197_vm0, %v1584_v0 }
  0x8a   : > { %852 = vmatprep.mubr.f32.mxu0 %v1656_v2  ;;  %1078 = vmatprep.mubr.f32.mxu1 %v1656_v2 }
  0x8d   : > { %1569 = vmatmul.mubr.msk.f32.gmra.mxu0 %vm197_vm0, %v1553_v1  ;;  %1601 = vmatmul.mubr.msk.f32.gmra.mxu1 %vm197_vm0, %v1585_v3  ;;  %v2190_v1 = vmov 0 }
  0xd1   : > { %v312_v4 = vpop.f32.mrf.mxu0  ;;  %v538_v5 = vpop.f32.mrf.mxu1 }
  0xd2   : > { %vm1085_vm1 = vcmp.ge.f32.partialorder %v312_v4, 0.0  ;;  %vm1117_vm2 = vcmp.ge.f32.partialorder %v538_v5, 0.0  ;;  %v2192_v5 = vmov 0 }
  0xd3   : > { %vm1898_vm3 = vmand %vm1085_vm1, %vm1117_vm2  ;;  %v314_v7 = vpop.f32.mrf.mxu0  ;;  %v540_v8 = vpop.f32.mrf.mxu1 }
  0xd4   : > { %vm1086_vm4 = vcmp.ge.f32.partialorder %v314_v7, 0.0  ;;  %vm1118_vm5 = vcmp.ge.f32.partialorder %v540_v8, 0.0 }
  0xd5   : > { %vm1902_vm6 = vmand %vm1086_vm4, %vm1118_vm5  ;;  %v318_v9 = vpop.f32.mrf.mxu0  ;;  %v544_v10 = vpop.f32.mrf.mxu1 }
  0xd6   : > { %vm1087_vm7 = vcmp.ge.f32.partialorder %v318_v9, 0.0  ;;  %vm1119_vm8 = vcmp.ge.f32.partialorder %v544_v10, 0.0  ;;  %v2194_v9 = vmov 0 }
  0xd7   : > { %vm1906_vm9 = vmand %vm1087_vm7, %vm1119_vm8  ;;  %v320_v12 = vpop.f32.mrf.mxu0  ;;  %v546_v13 = vpop.f32.mrf.mxu1 }
  0xd8   : > { %vm1088_vm10 = vcmp.ge.f32.partialorder %v320_v12, 0.0  ;;  %vm1120_vm11 = vcmp.ge.f32.partialorder %v546_v13, 0.0  ;;  %v2196_v13 = vmov 0 }
  0xd9   : > { %vm1910_vm12 = vmand %vm1088_vm10, %vm1120_vm11  ;;  %v324_v15 = vpop.f32.mrf.mxu0  ;;  %v550_v16 = vpop.f32.mrf.mxu1 }
  0xda   : > { %vm1089_vm13 = vcmp.ge.f32.partialorder %v324_v15, 0.0  ;;  %vm1121_vm14 = vcmp.ge.f32.partialorder %v550_v16, 0.0 }
  0xdb   : > { %vm1914_vm15 = vmand %vm1089_vm13, %vm1121_vm14  ;;  %v326_v18 = vpop.f32.mrf.mxu0  ;;  %v552_v19 = vpop.f32.mrf.mxu1  ;;  %vm1931_vm13 = vcmp.lt.s32.totalorder %v174_v26, 256 }
  0xdc   : > { %vm1090_vm0 = vcmp.ge.f32.partialorder %v326_v18, 0.0  ;;  %vm1122_vm1 = vcmp.ge.f32.partialorder %v552_v19, 0.0  ;;  %v2167_v30 = vsel %vm1931_vm13, 4294967295, %v2166_v30  ;;  %178 = vst.msk [vmem:[#allocation2] sm:$0x3] %vm1931_vm13, %v1657_v31  ;;  %v2198_v18 = vmov 0 }
  0xdd   : > { %vm1918_vm2 = vmand %vm1090_vm0, %vm1122_vm1  ;;  %v330_v21 = vpop.f32.mrf.mxu0  ;;  %v556_v22 = vpop.f32.mrf.mxu1 }
  0xde   : > { %vm1091_vm4 = vcmp.ge.f32.partialorder %v330_v21, 0.0  ;;  %vm1123_vm5 = vcmp.ge.f32.partialorder %v556_v22, 0.0  ;;  %v2200_v22 = vmov 0 }
  0xdf   : > { %vm1922_vm7 = vmand %vm1091_vm4, %vm1123_vm5  ;;  %v332_v24 = vpop.f32.mrf.mxu0  ;;  %v558_v25 = vpop.f32.mrf.mxu1 }
  0xe0   : > { %v2163_v23 = vsel %vm1922_vm7, 4294967295, %v2162_v23  ;;  %vm1092_vm8 = vcmp.ge.f32.partialorder %v332_v24, 0.0  ;;  %vm1124_vm10 = vcmp.ge.f32.partialorder %v558_v25, 0.0 }
  0xe1   : > { %vm1926_vm11 = vmand %vm1092_vm8, %vm1124_vm10  ;;  %v336_v28 = vpop.f32.mrf.mxu0  ;;  %v562_v29 = vpop.f32.mrf.mxu1 }
  0xe2   : > { %v2165_v27 = vsel %vm1926_vm11, 4294967295, %v2164_v27  ;;  %vm1093_vm14 = vcmp.ge.f32.partialorder %v336_v28, 0.0  ;;  %vm1125_vm0 = vcmp.ge.f32.partialorder %v562_v29, 0.0  ;;  %v2202_v28 = vmov 0 }
  0xe3   : > { %vm1937_vm1 = vmand %vm1093_vm14, %vm1125_vm0  ;;  %v338_v33 = vpop.f32.mrf.mxu0  ;;  %v564_v34 = vpop.f32.mrf.mxu1 }
  0xe4   : > { %v2169_v32 = vsel %vm1937_vm1, 4294967295, %v2168_v32  ;;  %vm1094_vm4 = vcmp.ge.f32.partialorder %v338_v33, 0.0  ;;  %vm1126_vm5 = vcmp.ge.f32.partialorder %v564_v34, 0.0  ;;  %v2204_v33 = vmov 0 }
  0xe5   : > { %vm1941_vm8 = vmand %vm1094_vm4, %vm1126_vm5  ;;  %v342_v36 = vpop.f32.mrf.mxu0  ;;  %v568_v37 = vpop.f32.mrf.mxu1 }
  0xe6   : > { %v2171_v35 = vsel %vm1941_vm8, 4294967295, %v2170_v35  ;;  %vm1095_vm10 = vcmp.ge.f32.partialorder %v342_v36, 0.0  ;;  %vm1127_vm11 = vcmp.ge.f32.partialorder %v568_v37, 0.0  ;;  %v2206_v37 = vmov 0 }
  0xe7   : > { %vm1945_vm7 = vmand %vm1095_vm10, %vm1127_vm11  ;;  %v344_v39 = vpop.f32.mrf.mxu0  ;;  %v570_v40 = vpop.f32.mrf.mxu1 }
  0xe8   : > { %v2173_v38 = vsel %vm1945_vm7, 4294967295, %v2172_v38  ;;  %vm1096_vm14 = vcmp.ge.f32.partialorder %v344_v39, 0.0  ;;  %vm1128_vm0 = vcmp.ge.f32.partialorder %v570_v40, 0.0 }
  0xe9   : > { %vm1949_vm13 = vmand %vm1096_vm14, %vm1128_vm0  ;;  %v348_v42 = vpop.f32.mrf.mxu0  ;;  %v574_v43 = vpop.f32.mrf.mxu1 }
  0xea   : > { %v2175_v41 = vsel %vm1949_vm13, 4294967295, %v2174_v41  ;;  %vm1097_vm4 = vcmp.ge.f32.partialorder %v348_v42, 0.0  ;;  %vm1129_vm5 = vcmp.ge.f32.partialorder %v574_v43, 0.0  ;;  %v2208_v42 = vmov 0 }
  0xeb   : > { %vm1953_vm8 = vmand %vm1097_vm4, %vm1129_vm5  ;;  %v350_v45 = vpop.f32.mrf.mxu0  ;;  %v576_v46 = vpop.f32.mrf.mxu1 }
  0xec   : > { %v2177_v44 = vsel %vm1953_vm8, 4294967295, %v2176_v44  ;;  %vm1098_vm11 = vcmp.ge.f32.partialorder %v350_v45, 0.0  ;;  %vm1130_vm10 = vcmp.ge.f32.partialorder %v576_v46, 0.0  ;;  %v2210_v46 = vmov 0 }
  0xed   : > { %vm1957_vm7 = vmand %vm1098_vm11, %vm1130_vm10  ;;  %v354_v48 = vpop.f32.mrf.mxu0  ;;  %v580_v49 = vpop.f32.mrf.mxu1 }
  0xee   : > { %v2179_v47 = vsel %vm1957_vm7, 4294967295, %v2178_v47  ;;  %vm1099_vm14 = vcmp.ge.f32.partialorder %v354_v48, 0.0  ;;  %vm1131_vm0 = vcmp.ge.f32.partialorder %v580_v49, 0.0 }
  0xef   : > { %vm1961_vm13 = vmand %vm1099_vm14, %vm1131_vm0  ;;  %v356_v51 = vpop.f32.mrf.mxu0  ;;  %v582_v52 = vpop.f32.mrf.mxu1 }
  0xf0   : > { %v2181_v50 = vsel %vm1961_vm13, 4294967295, %v2180_v50  ;;  %vm1100_vm4 = vcmp.ge.f32.partialorder %v356_v51, 0.0  ;;  %vm1132_vm5 = vcmp.ge.f32.partialorder %v582_v52, 0.0  ;;  %v2212_v51 = vmov 0 }
  0xf1   : > { %vm1965_vm8 = vmand %vm1100_vm4, %vm1132_vm5  ;;  %v360_v54 = vpop.f32.mrf.mxu0  ;;  %v586_v55 = vpop.f32.mrf.mxu1 }
  0xf2   : > { %v2183_v53 = vsel %vm1965_vm8, 4294967295, %v2182_v53  ;;  %vm1101_vm11 = vcmp.ge.f32.partialorder %v360_v54, 0.0  ;;  %vm1133_vm10 = vcmp.ge.f32.partialorder %v586_v55, 0.0 }
  0xf3   : > { %vm1969_vm7 = vmand %vm1101_vm11, %vm1133_vm10  ;;  %v362_v57 = vpop.f32.mrf.mxu0  ;;  %v588_v58 = vpop.f32.mrf.mxu1 }
  0xf4   : > { %v2185_v56 = vsel %vm1969_vm7, 4294967295, %v2184_v56  ;;  %vm1102_vm14 = vcmp.ge.f32.partialorder %v362_v57, 0.0  ;;  %vm1134_vm0 = vcmp.ge.f32.partialorder %v588_v58, 0.0 }
  0xf5   : > { %vm1973_vm13 = vmand %vm1102_vm14, %vm1134_vm0  ;;  %v366_v60 = vpop.f32.mrf.mxu0  ;;  %v592_v61 = vpop.f32.mrf.mxu1 }
  0xf6   : > { %v2187_v59 = vsel %vm1973_vm13, 4294967295, %v2186_v59  ;;  %vm1103_vm4 = vcmp.ge.f32.partialorder %v366_v60, 0.0  ;;  %vm1135_vm5 = vcmp.ge.f32.partialorder %v592_v61, 0.0 }
  0xf7   : > { %vm1977_vm8 = vmand %vm1103_vm4, %vm1135_vm5  ;;  %v368_v63 = vpop.f32.mrf.mxu0  ;;  %v594_v0 = vpop.f32.mrf.mxu1 }
  0xf8   : > { %v2189_v62 = vsel %vm1977_vm8, 4294967295, %v2188_v62  ;;  %vm1104_vm11 = vcmp.ge.f32.partialorder %v368_v63, 0.0  ;;  %vm1136_vm10 = vcmp.ge.f32.partialorder %v594_v0, 0.0 }
  0xf9   : > { %vm1981_vm7 = vmand %vm1104_vm11, %vm1136_vm10  ;;  %v372_v3 = vpop.f32.mrf.mxu0  ;;  %v598_v4 = vpop.f32.mrf.mxu1 }
  0xfa   : > { %v2191_v1 = vsel %vm1981_vm7, 4294967295, %v2190_v1  ;;  %vm1105_vm14 = vcmp.ge.f32.partialorder %v372_v3, 0.0  ;;  %vm1137_vm0 = vcmp.ge.f32.partialorder %v598_v4, 0.0 }
  0xfb   : > { %vm1985_vm13 = vmand %vm1105_vm14, %vm1137_vm0  ;;  %v374_v7 = vpop.f32.mrf.mxu0  ;;  %v600_v8 = vpop.f32.mrf.mxu1 }
  0xfc   : > { %v2193_v5 = vsel %vm1985_vm13, 4294967295, %v2192_v5  ;;  %vm1106_vm4 = vcmp.ge.f32.partialorder %v374_v7, 0.0  ;;  %vm1138_vm5 = vcmp.ge.f32.partialorder %v600_v8, 0.0 }
  0xfd   : > { %vm1989_vm8 = vmand %vm1106_vm4, %vm1138_vm5  ;;  %v378_v10 = vpop.f32.mrf.mxu0  ;;  %v604_v12 = vpop.f32.mrf.mxu1 }
  0xfe   : > { %v2195_v9 = vsel %vm1989_vm8, 4294967295, %v2194_v9  ;;  %vm1107_vm11 = vcmp.ge.f32.partialorder %v378_v10, 0.0  ;;  %vm1139_vm10 = vcmp.ge.f32.partialorder %v604_v12, 0.0 }
  0xff   : > { %vm1993_vm7 = vmand %vm1107_vm11, %vm1139_vm10  ;;  %v380_v15 = vpop.f32.mrf.mxu0  ;;  %v606_v16 = vpop.f32.mrf.mxu1 }
 0x100   : > { %v2197_v13 = vsel %vm1993_vm7, 4294967295, %v2196_v13  ;;  %vm1108_vm14 = vcmp.ge.f32.partialorder %v380_v15, 0.0  ;;  %vm1140_vm0 = vcmp.ge.f32.partialorder %v606_v16, 0.0 }
 0x101   : > { %vm1997_vm13 = vmand %vm1108_vm14, %vm1140_vm0  ;;  %v384_v19 = vpop.f32.mrf.mxu0  ;;  %v610_v21 = vpop.f32.mrf.mxu1 }
 0x102   : > { %v2199_v18 = vsel %vm1997_vm13, 4294967295, %v2198_v18  ;;  %vm1109_vm4 = vcmp.ge.f32.partialorder %v384_v19, 0.0  ;;  %vm1141_vm5 = vcmp.ge.f32.partialorder %v610_v21, 0.0 }
 0x103   : > { %vm2001_vm8 = vmand %vm1109_vm4, %vm1141_vm5  ;;  %v386_v24 = vpop.f32.mrf.mxu0  ;;  %v612_v25 = vpop.f32.mrf.mxu1 }
 0x104   : > { %v2201_v22 = vsel %vm2001_vm8, 4294967295, %v2200_v22  ;;  %vm1110_vm11 = vcmp.ge.f32.partialorder %v386_v24, 0.0  ;;  %vm1142_vm10 = vcmp.ge.f32.partialorder %v612_v25, 0.0 }
 0x105   : > { %vm2005_vm7 = vmand %vm1110_vm11, %vm1142_vm10  ;;  %v390_v29 = vpop.f32.mrf.mxu0  ;;  %v616_v31 = vpop.f32.mrf.mxu1 }
 0x106   : > { %v2203_v28 = vsel %vm2005_vm7, 4294967295, %v2202_v28  ;;  %vm1111_vm14 = vcmp.ge.f32.partialorder %v390_v29, 0.0  ;;  %vm1143_vm0 = vcmp.ge.f32.partialorder %v616_v31, 0.0 }
 0x107   : > { %vm2009_vm13 = vmand %vm1111_vm14, %vm1143_vm0  ;;  %v392_v34 = vpop.f32.mrf.mxu0  ;;  %v618_v36 = vpop.f32.mrf.mxu1 }
 0x108   : > { %v2205_v33 = vsel %vm2009_vm13, 4294967295, %v2204_v33  ;;  %vm1112_vm4 = vcmp.ge.f32.partialorder %v392_v34, 0.0  ;;  %vm1144_vm5 = vcmp.ge.f32.partialorder %v618_v36, 0.0 }
 0x109   : > { %vm2013_vm8 = vmand %vm1112_vm4, %vm1144_vm5  ;;  %v396_v39 = vpop.f32.mrf.mxu0  ;;  %v622_v40 = vpop.f32.mrf.mxu1 }
 0x10a   : > { %v2207_v37 = vsel %vm2013_vm8, 4294967295, %v2206_v37  ;;  %vm1113_vm11 = vcmp.ge.f32.partialorder %v396_v39, 0.0  ;;  %vm1145_vm10 = vcmp.ge.f32.partialorder %v622_v40, 0.0 }
 0x10b   : > { %vm2017_vm7 = vmand %vm1113_vm11, %vm1145_vm10  ;;  %v398_v43 = vpop.f32.mrf.mxu0  ;;  %v624_v45 = vpop.f32.mrf.mxu1 }
 0x10c   : > { %v2209_v42 = vsel %vm2017_vm7, 4294967295, %v2208_v42  ;;  %vm1114_vm14 = vcmp.ge.f32.partialorder %v398_v43, 0.0  ;;  %vm1146_vm0 = vcmp.ge.f32.partialorder %v624_v45, 0.0 }
 0x10d   : > { %vm2021_vm13 = vmand %vm1114_vm14, %vm1146_vm0  ;;  %v402_v48 = vpop.f32.mrf.mxu0  ;;  %v628_v49 = vpop.f32.mrf.mxu1 }
 0x10e   : > { %v2211_v46 = vsel %vm2021_vm13, 4294967295, %v2210_v46  ;;  %vm1115_vm4 = vcmp.ge.f32.partialorder %v402_v48, 0.0  ;;  %vm1147_vm5 = vcmp.ge.f32.partialorder %v628_v49, 0.0 }
 0x10f   : > { %vm2025_vm8 = vmand %vm1115_vm4, %vm1147_vm5  ;;  %v2029_v52 = vpop.f32.mrf.mxu0  ;;  %v2031_v54 = vpop.f32.mrf.mxu1 }
 0x110   : > { %v2213_v51 = vsel %vm2025_vm8, 4294967295, %v2212_v51 }
 0x111   : > { %v764_v55 = vpop.f32.mrf.mxu0  ;;  %v990_v57 = vpop.f32.mrf.mxu1 }
 0x112   : > { %vm1181_vm11 = vcmp.ge.f32.partialorder %v764_v55, 0.0  ;;  %vm1245_vm10 = vcmp.gt.f32.partialorder %v990_v57, 0.0 }
 0x113   : > { %vm1213_vm14 = vmand %vm1898_vm3, %vm1181_vm11  ;;  %v766_v58 = vpop.f32.mrf.mxu0  ;;  %v992_v60 = vpop.f32.mrf.mxu1 }
 0x114   : > { %vm2035_vm0 = vmand %vm1213_vm14, %vm1245_vm10  ;;  %vm1182_vm4 = vcmp.ge.f32.partialorder %v766_v58, 0.0  ;;  %vm1246_vm5 = vcmp.gt.f32.partialorder %v992_v60, 0.0 }
 0x115   : > { %vm1214_vm8 = vmand %vm1902_vm6, %vm1182_vm4  ;;  %v770_v63 = vpop.f32.mrf.mxu0  ;;  %v996_v0 = vpop.f32.mrf.mxu1  ;;  %v1309_v14 = vsel %vm2035_vm0, %v990_v57, 1e+30 }
 0x116   : > { %vm2041_vm13 = vmand %vm1214_vm8, %vm1246_vm5  ;;  %vm1183_vm7 = vcmp.ge.f32.partialorder %v770_v63, 0.0  ;;  %vm1247_vm1 = vcmp.gt.f32.partialorder %v996_v0, 0.0 }
 0x117   : > { %vm1215_vm3 = vmand %vm1906_vm9, %vm1183_vm7  ;;  %v772_v6 = vpop.f32.mrf.mxu0  ;;  %v998_v4 = vpop.f32.mrf.mxu1  ;;  %v1310_v17 = vsel %vm2041_vm13, %v992_v60, 1e+30 }
 0x118   : > { %vm2047_vm11 = vmand %vm1215_vm3, %vm1247_vm1  ;;  %vm1184_vm10 = vcmp.ge.f32.partialorder %v772_v6, 0.0  ;;  %vm1248_vm14 = vcmp.gt.f32.partialorder %v998_v4, 0.0 }
 0x119   : > { %vm1216_vm6 = vmand %vm1910_vm12, %vm1184_vm10  ;;  %v776_v2 = vpop.f32.mrf.mxu0  ;;  %v1002_v8 = vpop.f32.mrf.mxu1  ;;  %v1311_v20 = vsel %vm2047_vm11, %v996_v0, 1e+30 }
 0x11a   : > { %vm2053_vm8 = vmand %vm1216_vm6, %vm1248_vm14  ;;  %vm1185_vm4 = vcmp.ge.f32.partialorder %v776_v2, 0.0  ;;  %vm1249_vm5 = vcmp.gt.f32.partialorder %v1002_v8, 0.0 }
 0x11b   : > { %vm1217_vm9 = vmand %vm1914_vm15, %vm1185_vm4  ;;  %v778_v11 = vpop.f32.mrf.mxu0  ;;  %v1004_v12 = vpop.f32.mrf.mxu1  ;;  %vm2222_vm15 = vnez %v2163_v23  ;;  %v1312_v23 = vsel %vm2053_vm8, %v998_v4, 1e+30 }
 0x11c   : > { %vm1281_vm7 = vmand %vm1217_vm9, %vm1249_vm5  ;;  %vm1186_vm1 = vcmp.ge.f32.partialorder %v778_v11, 0.0  ;;  %vm1250_vm3 = vcmp.gt.f32.partialorder %v1004_v12, 0.0 }
 0x11d   : > { %v1313_v15 = vsel %vm1281_vm7, %v1002_v8, 1e+30  ;;  %vm1218_vm12 = vmand %vm1918_vm2, %vm1186_vm1  ;;  %v782_v16 = vpop.f32.mrf.mxu0  ;;  %v1008_v19 = vpop.f32.mrf.mxu1  ;;  %vm2223_vm2 = vnez %v2165_v27 }
 0x11e   : > { %v1341_v21 = vmin.f32 %v1309_v14, %v1313_v15  ;;  %vm1282_vm10 = vmand %vm1218_vm12, %vm1250_vm3  ;;  %vm1187_vm14 = vcmp.ge.f32.partialorder %v782_v16, 0.0  ;;  %vm1251_vm6 = vcmp.gt.f32.partialorder %v1008_v19, 0.0  ;;  %vm2224_vm12 = vnez %v2169_v32 }
 0x11f   : > { %v1314_v24 = vsel %vm1282_vm10, %v1004_v12, 1e+30  ;;  %vm1219_vm4 = vmand %vm2222_vm15, %vm1187_vm14  ;;  %v784_v25 = vpop.f32.mrf.mxu0  ;;  %v1010_v29 = vpop.f32.mrf.mxu1  ;;  %vm2225_vm15 = vnez %v2171_v35 }
 0x120   : > { %v1362_v31 = vmin.f32 %v1310_v17, %v1314_v24  ;;  %vm1283_vm0 = vmand %vm1219_vm4, %vm1251_vm6  ;;  %vm1188_vm5 = vcmp.ge.f32.partialorder %v784_v25, 0.0  ;;  %vm1252_vm9 = vcmp.gt.f32.partialorder %v1010_v29, 0.0 }
 0x121   : > { %v1315_v34 = vsel %vm1283_vm0, %v1008_v19, 1e+30  ;;  %vm1220_vm7 = vmand %vm2223_vm2, %vm1188_vm5  ;;  %v788_v36 = vpop.f32.mrf.mxu0  ;;  %v1014_v39 = vpop.f32.mrf.mxu1 }
 0x122   : > { %v1342_v40 = vmin.f32 %v1311_v20, %v1315_v34  ;;  %vm1284_vm13 = vmand %vm1220_vm7, %vm1252_vm9  ;;  %vm1189_vm1 = vcmp.ge.f32.partialorder %v788_v36, 0.0  ;;  %vm1253_vm3 = vcmp.gt.f32.partialorder %v1014_v39, 0.0  ;;  %vm2226_vm9 = vnez %v2173_v38 }
 0x123   : > { %v1316_v43 = vsel %vm1284_vm13, %v1010_v29, 1e+30  ;;  %vm1221_vm10 = vmand %vm2224_vm12, %vm1189_vm1  ;;  %v790_v45 = vpop.f32.mrf.mxu0  ;;  %v1016_v48 = vpop.f32.mrf.mxu1 }
 0x124   : > { %v1363_v49 = vmin.f32 %v1312_v23, %v1316_v43  ;;  %vm1285_vm11 = vmand %vm1221_vm10, %vm1253_vm3  ;;  %vm1190_vm14 = vcmp.ge.f32.partialorder %v790_v45, 0.0  ;;  %vm1254_vm6 = vcmp.gt.f32.partialorder %v1016_v48, 0.0  ;;  %vm2227_vm3 = vnez %v2175_v41 }
 0x125   : > { %v1317_v27 = vsel %vm1285_vm11, %v1014_v39, 1e+30  ;;  %vm1222_vm4 = vmand %vm2225_vm15, %vm1190_vm14  ;;  %v794_v55 = vpop.f32.mrf.mxu0  ;;  %v1020_v57 = vpop.f32.mrf.mxu1 }
 0x126   : > { %v1343_v58 = vmin.f32 %v1341_v21, %v1317_v27  ;;  %vm1286_vm0 = vmand %vm1222_vm4, %vm1254_vm6  ;;  %vm1191_vm5 = vcmp.ge.f32.partialorder %v794_v55, 0.0  ;;  %vm1255_vm8 = vcmp.gt.f32.partialorder %v1020_v57, 0.0  ;;  %vm2228_vm6 = vnez %v2177_v44 }
 0x127   : > { %v1318_v60 = vsel %vm1286_vm0, %v1016_v48, 1e+30  ;;  %vm1223_vm2 = vmand %vm2226_vm9, %vm1191_vm5  ;;  %v796_v32 = vpop.f32.mrf.mxu0  ;;  %v1022_v61 = vpop.f32.mrf.mxu1 }
 0x128   : > { %v1364_v63 = vmin.f32 %v1362_v31, %v1318_v60  ;;  %vm1287_vm7 = vmand %vm1223_vm2, %vm1255_vm8  ;;  %vm1192_vm13 = vcmp.ge.f32.partialorder %v796_v32, 0.0  ;;  %vm1256_vm1 = vcmp.gt.f32.partialorder %v1022_v61, 0.0  ;;  %vm2229_vm8 = vnez %v2179_v47 }
 0x129   : > { %v1319_v0 = vsel %vm1287_vm7, %v1020_v57, 1e+30  ;;  %vm1224_vm12 = vmand %vm2227_vm3, %vm1192_vm13  ;;  %v800_v35 = vpop.f32.mrf.mxu0  ;;  %v1026_v3 = vpop.f32.mrf.mxu1 }
 0x12a   : > { %v1344_v6 = vmin.f32 %v1342_v40, %v1319_v0  ;;  %vm1288_vm10 = vmand %vm1224_vm12, %vm1256_vm1  ;;  %vm1193_vm11 = vcmp.ge.f32.partialorder %v800_v35, 0.0  ;;  %vm1257_vm14 = vcmp.gt.f32.partialorder %v1026_v3, 0.0  ;;  %vm2230_vm1 = vnez %v2181_v50 }
 0x12b   : > { %v1320_v4 = vsel %vm1288_vm10, %v1022_v61, 1e+30  ;;  %vm1225_vm15 = vmand %vm2228_vm6, %vm1193_vm11  ;;  %v802_v38 = vpop.f32.mrf.mxu0  ;;  %v1028_v7 = vpop.f32.mrf.mxu1 }
 0x12c   : > { %v1365_v2 = vmin.f32 %v1363_v49, %v1320_v4  ;;  %vm1289_vm4 = vmand %vm1225_vm15, %vm1257_vm14  ;;  %vm1194_vm0 = vcmp.ge.f32.partialorder %v802_v38, 0.0  ;;  %vm1258_vm5 = vcmp.gt.f32.partialorder %v1028_v7, 0.0  ;;  %vm2231_vm14 = vnez %v2183_v53 }
 0x12d   : > { %v1321_v8 = vsel %vm1289_vm4, %v1026_v3, 1e+30  ;;  %vm1226_vm9 = vmand %vm2229_vm8, %vm1194_vm0  ;;  %v806_v41 = vpop.f32.mrf.mxu0  ;;  %v1032_v10 = vpop.f32.mrf.mxu1 }
 0x12e   : > { %v1345_v11 = vmin.f32 %v1343_v58, %v1321_v8  ;;  %vm1290_vm2 = vmand %vm1226_vm9, %vm1258_vm5  ;;  %vm1195_vm7 = vcmp.ge.f32.partialorder %v806_v41, 0.0  ;;  %vm1259_vm13 = vcmp.gt.f32.partialorder %v1032_v10, 0.0  ;;  %vm2232_vm5 = vnez %v2185_v56 }
 0x12f   : > { %v1322_v12 = vsel %vm1290_vm2, %v1028_v7, 1e+30  ;;  %vm1227_vm3 = vmand %vm2230_vm1, %vm1195_vm7  ;;  %v808_v44 = vpop.f32.mrf.mxu0  ;;  %v1034_v14 = vpop.f32.mrf.mxu1 }
 0x130   : > { %v1366_v15 = vmin.f32 %v1364_v63, %v1322_v12  ;;  %vm1291_vm12 = vmand %vm1227_vm3, %vm1259_vm13  ;;  %vm1196_vm10 = vcmp.ge.f32.partialorder %v808_v44, 0.0  ;;  %vm1260_vm11 = vcmp.gt.f32.partialorder %v1034_v14, 0.0  ;;  %vm2233_vm13 = vnez %v2187_v59 }
 0x131   : > { %v1323_v16 = vsel %vm1291_vm12, %v1032_v10, 1e+30  ;;  %vm1228_vm6 = vmand %vm2231_vm14, %vm1196_vm10  ;;  %v812_v47 = vpop.f32.mrf.mxu0  ;;  %v1038_v19 = vpop.f32.mrf.mxu1 }
 0x132   : > { %v1346_v21 = vmin.f32 %v1344_v6, %v1323_v16  ;;  %vm1292_vm15 = vmand %vm1228_vm6, %vm1260_vm11  ;;  %vm1197_vm4 = vcmp.ge.f32.partialorder %v812_v47, 0.0  ;;  %vm1261_vm0 = vcmp.gt.f32.partialorder %v1038_v19, 0.0  ;;  %vm2234_vm11 = vnez %v2189_v62 }
 0x133   : > { %v1324_v17 = vsel %vm1292_vm15, %v1034_v14, 1e+30  ;;  %vm1229_vm8 = vmand %vm2232_vm5, %vm1197_vm4  ;;  %v814_v50 = vpop.f32.mrf.mxu0  ;;  %v1040_v24 = vpop.f32.mrf.mxu1 }
 0x134   : > { %v1367_v25 = vmin.f32 %v1365_v2, %v1324_v17  ;;  %vm1293_vm9 = vmand %vm1229_vm8, %vm1261_vm0  ;;  %vm1198_vm2 = vcmp.ge.f32.partialorder %v814_v50, 0.0  ;;  %vm1262_vm7 = vcmp.gt.f32.partialorder %v1040_v24, 0.0  ;;  %vm2235_vm0 = vnez %v2191_v1 }
 0x135   : > { %v1325_v29 = vsel %vm1293_vm9, %v1038_v19, 1e+30  ;;  %vm1230_vm1 = vmand %vm2233_vm13, %vm1198_vm2  ;;  %v818_v53 = vpop.f32.mrf.mxu0  ;;  %v1044_v31 = vpop.f32.mrf.mxu1 }
 0x136   : > { %v1347_v20 = vmin.f32 %v1345_v11, %v1325_v29  ;;  %vm1294_vm3 = vmand %vm1230_vm1, %vm1262_vm7  ;;  %vm1199_vm12 = vcmp.ge.f32.partialorder %v818_v53, 0.0  ;;  %vm1263_vm10 = vcmp.gt.f32.partialorder %v1044_v31, 0.0  ;;  %vm2236_vm7 = vnez %v2193_v5 }
 0x137   : > { %v1326_v34 = vsel %vm1294_vm3, %v1040_v24, 1e+30  ;;  %vm1231_vm14 = vmand %vm2234_vm11, %vm1199_vm12  ;;  %v820_v56 = vpop.f32.mrf.mxu0  ;;  %v1046_v36 = vpop.f32.mrf.mxu1 }
 0x138   : > { %v1368_v39 = vmin.f32 %v1366_v15, %v1326_v34  ;;  %vm1295_vm6 = vmand %vm1231_vm14, %vm1263_vm10  ;;  %vm1200_vm15 = vcmp.ge.f32.partialorder %v820_v56, 0.0  ;;  %vm1264_vm4 = vcmp.gt.f32.partialorder %v1046_v36, 0.0  ;;  %vm2237_vm10 = vnez %v2195_v9 }
 0x139   : > { %v1327_v40 = vsel %vm1295_vm6, %v1044_v31, 1e+30  ;;  %vm1232_vm5 = vmand %vm2235_vm0, %vm1200_vm15  ;;  %v824_v59 = vpop.f32.mrf.mxu0  ;;  %v1050_v23 = vpop.f32.mrf.mxu1 }
 0x13a   : > { %v1348_v43 = vmin.f32 %v1346_v21, %v1327_v40  ;;  %vm1296_vm8 = vmand %vm1232_vm5, %vm1264_vm4  ;;  %vm1201_vm9 = vcmp.ge.f32.partialorder %v824_v59, 0.0  ;;  %vm1265_vm2 = vcmp.gt.f32.partialorder %v1050_v23, 0.0  ;;  %vm2238_vm4 = vnez %v2197_v13 }
 0x13b   : > { %v1328_v45 = vsel %vm1296_vm8, %v1046_v36, 1e+30  ;;  %vm1233_vm13 = vmand %vm2236_vm7, %vm1201_vm9  ;;  %v826_v62 = vpop.f32.mrf.mxu0  ;;  %v1052_v48 = vpop.f32.mrf.mxu1  ;;  %v1658_v36 = vmov 1966171168  }
 0x13c   : > { %v1369_v49 = vmin.f32 %v1367_v25, %v1328_v45  ;;  %vm1297_vm1 = vmand %vm1233_vm13, %vm1265_vm2  ;;  %vm1202_vm3 = vcmp.ge.f32.partialorder %v826_v62, 0.0  ;;  %vm1266_vm12 = vcmp.gt.f32.partialorder %v1052_v48, 0.0  ;;  %vm2239_vm2 = vnez %v2199_v18 }
 0x13d   : > { %v1329_v27 = vsel %vm1297_vm1, %v1050_v23, 1e+30  ;;  %vm1234_vm11 = vmand %vm2237_vm10, %vm1202_vm3  ;;  %v830_v1 = vpop.f32.mrf.mxu0  ;;  %v1056_v55 = vpop.f32.mrf.mxu1  ;;  %v1391_v62 = vshrl.u32 %v174_v26, 7 }
 0x13e   : > { %v1349_v57 = vmin.f32 %v1347_v20, %v1329_v27  ;;  %vm1298_vm14 = vmand %vm1234_vm11, %vm1266_vm12  ;;  %vm1203_vm6 = vcmp.ge.f32.partialorder %v830_v1, 0.0  ;;  %vm1267_vm15 = vcmp.gt.f32.partialorder %v1056_v55, 0.0  ;;  %vm2240_vm12 = vnez %v2201_v22 }
 0x13f   : > { %v1330_v58 = vsel %vm1298_vm14, %v1052_v48, 1e+30  ;;  %vm1235_vm0 = vmand %vm2238_vm4, %vm1203_vm6  ;;  %v832_v5 = vpop.f32.mrf.mxu0  ;;  %v1058_v60 = vpop.f32.mrf.mxu1  ;;  %vm1148_vm4 = vcmp.ge.f32.partialorder %v2031_v54, 0.0 }
 0x140   : > { %v1370_v32 = vmin.f32 %v1368_v39, %v1330_v58  ;;  %vm1299_vm5 = vmand %vm1235_vm0, %vm1267_vm15  ;;  %vm1204_vm8 = vcmp.ge.f32.partialorder %v832_v5, 0.0  ;;  %vm1268_vm9 = vcmp.gt.f32.partialorder %v1058_v60, 0.0  ;;  %vm1116_vm15 = vcmp.ge.f32.partialorder %v2029_v52, 0.0  ;;  %v1383_v58 = vld [vmem:[#allocation2] sm:$0x3] }
 0x141   : > { %v1331_v61 = vsel %vm1299_vm5, %v1056_v55, 1e+30  ;;  %vm1236_vm7 = vmand %vm2239_vm2, %vm1204_vm8  ;;  %v836_v9 = vpop.f32.mrf.mxu0  ;;  %v1062_v63 = vpop.f32.mrf.mxu1  ;;  %vm2241_vm0 = vnez %v2203_v28  ;;  %v1388_v39 = vunpack.c.l.s4 %v1658_v36 }
 0x142   : > { %v1350_v0 = vmin.f32 %v1348_v43, %v1331_v61  ;;  %vm1300_vm13 = vmand %vm1236_vm7, %vm1268_vm9  ;;  %vm1205_vm1 = vcmp.ge.f32.partialorder %v836_v9, 0.0  ;;  %vm1269_vm3 = vcmp.gt.f32.partialorder %v1062_v63, 0.0  ;;  %vm2242_vm7 = vnez %v2205_v33 }
 0x143   : > { %v1332_v35 = vsel %vm1300_vm13, %v1058_v60, 1e+30  ;;  %vm1237_vm10 = vmand %vm2240_vm12, %vm1205_vm1  ;;  %v838_v13 = vpop.f32.mrf.mxu0  ;;  %v1064_v3 = vpop.f32.mrf.mxu1  ;;  %v1389_v45 = vunpack.c.0.s8 %v1388_v39 }
 0x144   : > { %v1371_v6 = vmin.f32 %v1369_v49, %v1332_v35  ;;  %vm1301_vm11 = vmand %vm1237_vm10, %vm1269_vm3  ;;  %vm1206_vm14 = vcmp.ge.f32.partialorder %v838_v13, 0.0  ;;  %vm1270_vm6 = vcmp.gt.f32.partialorder %v1064_v3, 0.0 }
 0x145   : > { %v1333_v18 = vsel %vm1301_vm11, %v1062_v63, 1e+30  ;;  %vm1238_vm5 = vmand %vm2241_vm0, %vm1206_vm14  ;;  %v842_v4 = vpop.f32.mrf.mxu0  ;;  %v1068_v38 = vpop.f32.mrf.mxu1  ;;  %vm2245_vm11 = vnez %v2207_v37  ;;  %v1392_v1 = vsub.s32 %v1389_v45, %v1391_v62 }
 0x146   : > { %v1351_v7 = vmin.f32 %v1349_v57, %v1333_v18  ;;  %vm1302_vm8 = vmand %vm1238_vm5, %vm1270_vm6  ;;  %vm1207_vm9 = vcmp.ge.f32.partialorder %v842_v4, 0.0  ;;  %vm1271_vm2 = vcmp.gt.f32.partialorder %v1068_v38, 0.0 }
 0x147   : > { %v1334_v22 = vsel %vm1302_vm8, %v1064_v3, 1e+30  ;;  %vm1239_vm13 = vmand %vm2242_vm7, %vm1207_vm9  ;;  %v844_v2 = vpop.f32.mrf.mxu0  ;;  %v1070_v8 = vpop.f32.mrf.mxu1  ;;  %vm2247_vm7 = vnez %v2211_v46 }
 0x148   : > { %vm2113_vm1 = vmand %vm1116_vm15, %vm1148_vm4  ;;  %v1372_v54 = vmin.f32 %v1370_v32, %v1334_v22  ;;  %vm1208_vm12 = vcmp.ge.f32.partialorder %v844_v2, 0.0  ;;  %vm1272_vm10 = vcmp.gt.f32.partialorder %v1070_v8, 0.0  ;;  %vm2246_vm15 = vnez %v2209_v42 }
 0x149   : > { %vm1303_vm3 = vmand %vm1239_vm13, %vm1271_vm2  ;;  %v848_v41 = vpop.f32.mrf.mxu0  ;;  %v1074_v10 = vpop.f32.mrf.mxu1 }
 0x14a   : > { %v1335_v28 = vsel %vm1303_vm3, %v1068_v38, 1e+30  ;;  %vm1240_vm14 = vmand %vm2245_vm11, %vm1208_vm12  ;;  %vm1209_vm0 = vcmp.ge.f32.partialorder %v848_v41, 0.0  ;;  %vm1273_vm5 = vcmp.gt.f32.partialorder %v1074_v10, 0.0  ;;  %vm2248_vm11 = vnez %v2213_v51 }
 0x14b   : > { %v1352_v11 = vmin.f32 %v1350_v0, %v1335_v28  ;;  %vm1304_vm6 = vmand %vm1240_vm14, %vm1272_vm10  ;;  %v850_v12 = vpop.f32.mrf.mxu0  ;;  %v1076_v44 = vpop.f32.mrf.mxu1 }
 0x14c   : > { %v1336_v33 = vsel %vm1304_vm6, %v1070_v8, 1e+30  ;;  %vm1241_vm4 = vmand %vm2246_vm15, %vm1209_vm0  ;;  %vm1210_vm9 = vcmp.ge.f32.partialorder %v850_v12, 0.0  ;;  %vm1274_vm2 = vcmp.gt.f32.partialorder %v1076_v44, 0.0 }
 0x14d   : > { %v1373_v14 = vmin.f32 %v1371_v6, %v1336_v33  ;;  %vm1305_vm8 = vmand %vm1241_vm4, %vm1273_vm5  ;;  %v854_v37 = vpop.f32.mrf.mxu0  ;;  %v1080_v16 = vpop.f32.mrf.mxu1 }
 0x14e   : > { %v1337_v15 = vsel %vm1305_vm8, %v1074_v10, 1e+30  ;;  %vm1242_vm13 = vmand %vm2247_vm7, %vm1210_vm9  ;;  %vm1211_vm12 = vcmp.ge.f32.partialorder %v854_v37, 0.0  ;;  %vm1275_vm10 = vcmp.gt.f32.partialorder %v1080_v16, 0.0 }
 0x14f   : > { %v1353_v47 = vmin.f32 %v1351_v7, %v1337_v15  ;;  %vm1306_vm3 = vmand %vm1242_vm13, %vm1274_vm2  ;;  %v856_v42 = vpop.f32.mrf.mxu0  ;;  %v1082_v21 = vpop.f32.mrf.mxu1 }
 0x150   : > { %v1338_v19 = vsel %vm1306_vm3, %v1076_v44, 1e+30  ;;  %vm1243_vm14 = vmand %vm2248_vm11, %vm1211_vm12  ;;  %vm1212_vm0 = vcmp.ge.f32.partialorder %v856_v42, 0.0  ;;  %vm1276_vm5 = vcmp.gt.f32.partialorder %v1082_v21, 0.0 }
 0x151   : > { %v1374_v17 = vmin.f32 %v1372_v54, %v1338_v19  ;;  %vm1307_vm6 = vmand %vm1243_vm14, %vm1275_vm10 }
 0x152   : > { %v1339_v50 = vsel %vm1307_vm6, %v1080_v16, 1e+30  ;;  %vm1244_vm15 = vmand %vm2113_vm1, %vm1212_vm0  ;;  %vm2249_vm1 = vnez %v2167_v30 }
 0x153   : > { %v1354_v46 = vmin.f32 %v1352_v11, %v1339_v50  ;;  %vm1308_vm4 = vmand %vm1244_vm15, %vm1276_vm5 }
 0x154   : > { %v1340_v24 = vsel %vm1308_vm4, %v1082_v21, 1e+30 }
 0x155   : > { %v1355_v25 = vmin.f32 %v1353_v47, %v1354_v46  ;;  %v1375_v29 = vmin.f32 %v1373_v14, %v1340_v24 }
 0x157   : > { %v1356_v53 = vrot.slane %v1355_v25, 4  ;;  %v1376_v31 = vmin.f32 %v1374_v17, %v1375_v29 }
 0x159   : > { %v1357_v20 = vmin.f32 %v1355_v25, %v1356_v53  ;;  %v1377_v51 = vrot.slane %v1376_v31, 4 }
 0x15b   : > { %v1358_v34 = vrot.slane %v1357_v20, 2  ;;  %v1378_v56 = vmin.f32 %v1376_v31, %v1377_v51 }
 0x15d   : > { %v1359_v40 = vmin.f32 %v1357_v20, %v1358_v34  ;;  %v1379_v59 = vrot.slane %v1378_v56, 2 }
 0x15f   : > { %v1360_v23 = vrot.slane %v1359_v40, 1  ;;  %v1380_v43 = vmin.f32 %v1378_v56, %v1379_v59 }
 0x161   : > { %v1381_v48 = vrot.slane %v1380_v43, 1  ;;  %v1361_v49 = vmin.f32 %v1359_v40, %v1360_v23 }
 0x163   : > { %v1382_v27 = vmin.f32 %v1380_v43, %v1381_v48 }
 0x165   : > { %v1386_v55 = vcombine.low %v1361_v49, %v1382_v27 }
 0x167   : > { %v1393_v57 = vrot.slane %v1386_v55, %v1392_v1 }
 0x169   : > { %v1400_v5 = vrot.slane %v1393_v57, %v1392_v1 }
 0x16b   : > { %v1402_v60 = vmin.f32 %v1383_v58, %v1400_v5 }
 0x16d   : > { %1407 = vst.msk [vmem:[#allocation2] sm:$0x3] %vm2249_vm1, %v1402_v60 }
 0x174   : > { %v1411_v32 = vld [vmem:[#allocation2] sm:$0x3] }
 0x175   : > { %vm1412_vm8 = vcmp.lt.f32.partialorder %v1411_v32, 5e+29 }
 0x176   : > { %v1413_v26 = vsel %vm1412_vm8, %v1411_v32, -1.0 }
 0x177   : > { %1414 = vst.msk [vmem:[%s169_s24] sm:$0x3] %vm2249_vm1, %v1413_v26 }
 0x178 PF: > { %s12_s11 = sadd.s32 1, %s1654_s11   ;;  %s2250_s9 = smov %s1650_s10 }
 0x179   : > { %p9_p5 = scmp.ge.s32.totalorder %s12_s11, 4   ;;  %s2251_s10 = smov %s2253_s12 }
 0x17b   :  { %11 = sbr.rel (!%p9_p5) target bundleno = 2 (0x2), region = 69 }

</bundles_post_ra>
